<compile_context>
chip_gen: v5e
topology: v5e:2x2
jax: 0.10.0
libtpu: 0.0.40
codegen_flags: <defaults>
</compile_context>

<pallas_src>
import functools

import jax
import jax.numpy as jnp
import numpy as np
from jax.experimental import pallas as pl
from jax.experimental.pallas import tpu as pltpu


def _round_up(x, m):
    return (x + m - 1) // m * m


def _cin_kernel(x_ref, g_ref, b_ref, out_ref, *, eps, inv_hw):
    """One grid step == one tile of (sample, channel) rows.

    x_ref   : [Rt, HWp]  rows = flattened (batch, channel); cols = spatial (+pad)
    g_ref   : [Rt, 1]    per-row gamma (already gathered by style_id)
    b_ref   : [Rt, 1]    per-row beta
    out_ref : [Rt, HWp]
    """
    x = x_ref[...].astype(jnp.float32)                     # single tile read
    # One-pass statistics (padded lanes are zero, so they drop out of the sums;
    # divide by the true spatial size, not the padded width).
    s1 = jnp.sum(x, axis=-1, keepdims=True)                # [Rt, 1]
    s2 = jnp.sum(x * x, axis=-1, keepdims=True)            # [Rt, 1]
    mean = s1 * inv_hw
    var = jnp.maximum(s2 * inv_hw - mean * mean, 0.0)      # biased variance
    inv = jax.lax.rsqrt(var + eps)                         # EUP rsqrt
    # Fold the affine: out = x * scale + shift  (2 VALU ops / element).
    scale = g_ref[...] * inv                               # [Rt, 1]
    shift = b_ref[...] - mean * scale                      # [Rt, 1]
    out_ref[...] = (x * scale + shift).astype(out_ref.dtype)


def batch_instance_norm2d(x, style_id, gamma, beta, *, eps=1e-5):
    """x: [B, C, H, W]; style_id: [B] int; gamma/beta: [S, C]."""
    B, C, H, W = x.shape
    HW = H * W
    R = B * C

    # Lane axis padded to a multiple of 128 -> unmasked vector stores.
    HWp = max(_round_up(HW, 128), 128)

    # Row tiling: keep one x block <= ~4 MiB (double-buffered in + out stays far
    # below the scoped VMEM limit on every generation), rows in multiples of 8.
    bytes_per_row = HWp * 4
    max_rows = max(8, (4 * 1024 * 1024) // bytes_per_row)
    if R <= max_rows:
        row_tile = R                       # whole problem in a single grid step
        R_pad = R
    else:
        row_tile = max(8, (max_rows // 8) * 8)
        R_pad = _round_up(R, row_tile)

    # Flatten + pre-gather the style-conditional affine params (tiny).
    x2 = x.reshape(R, HW)
    g2 = gamma[style_id].reshape(R, 1).astype(jnp.float32)
    b2 = beta[style_id].reshape(R, 1).astype(jnp.float32)

    if HWp != HW or R_pad != R:
        x2 = jnp.pad(x2, ((0, R_pad - R), (0, HWp - HW)))
    if R_pad != R:
        g2 = jnp.pad(g2, ((0, R_pad - R), (0, 0)), constant_values=1.0)
        b2 = jnp.pad(b2, ((0, R_pad - R), (0, 0)))

    grid = (R_pad // row_tile,)

    out = pl.pallas_call(
        functools.partial(_cin_kernel, eps=eps, inv_hw=1.0 / HW),
        out_shape=jax.ShapeDtypeStruct((R_pad, HWp), x.dtype),
        grid_spec=pltpu.PrefetchScalarGridSpec(
            num_scalar_prefetch=0,
            grid=grid,
            in_specs=[
                pl.BlockSpec((row_tile, HWp), lambda i: (i, 0)),
                pl.BlockSpec((row_tile, 1), lambda i: (i, 0)),
                pl.BlockSpec((row_tile, 1), lambda i: (i, 0)),
            ],
            out_specs=pl.BlockSpec((row_tile, HWp), lambda i: (i, 0)),
        ),
        compiler_params=pltpu.CompilerParams(
            dimension_semantics=("parallel",),   # row tiles are independent
        ),
    )(x2, g2, b2)

    if HWp != HW or R_pad != R:
        out = out[:R, :HW]
    return out.reshape(B, C, H, W)


# ----------------------------- pure-JAX reference ----------------------------
def _reference(x, style_id, gamma, beta, eps=1e-5):
    mean = jnp.mean(x, axis=(2, 3), keepdims=True)
    var = jnp.mean((x - mean) ** 2, axis=(2, 3), keepdims=True)
    xhat = (x - mean) * jax.lax.rsqrt(var + eps)
    g = gamma[style_id][:, :, None, None]
    b = beta[style_id][:, :, None, None]
    return xhat * g + b


# ----------------------------- main ------------------------------------------
if __name__ == "__main__":
    key = jax.random.PRNGKey(0)
    kx, ks, kg, kb = jax.random.split(key, 4)

    B, C, H, W = 2, 4, 16, 16     # batch, channels, spatial
    S = 3                         # number of styles (style_num)

    x = jax.random.normal(kx, (B, C, H, W), jnp.float32)
    style_id = jax.random.randint(ks, (B,), 0, S)
    gamma = 1.0 + 0.1 * jax.random.normal(kg, (S, C), jnp.float32)
    beta = 0.1 * jax.random.normal(kb, (S, C), jnp.float32)

    out = batch_instance_norm2d(x, style_id, gamma, beta)
    out = jax.block_until_ready(out)

    ref = _reference(x, style_id, gamma, beta)
    assert out.shape == (B, C, H, W), out.shape
    np.testing.assert_allclose(np.asarray(out), np.asarray(ref),
                               atol=1e-4, rtol=1e-4)
    print("KERNEL_OK")
</pallas_src>

<mosaic_0001>
module attributes {stable_mosaic.version = 11 : i64} {
  func.func @_cin_kernel(%arg0: i32, %arg1: memref<8x256xf32, #tpu.memory_space<vmem>>, %arg2: memref<8x1xf32, #tpu.memory_space<vmem>>, %arg3: memref<8x1xf32, #tpu.memory_space<vmem>>, %arg4: memref<8x256xf32, #tpu.memory_space<vmem>>) attributes {dimension_semantics = [#tpu.dimension_semantics<parallel>], iteration_bounds = array<i64: 1>, scalar_prefetch = 0 : i64, scratch_operands = 0 : i64, tpu.core_type = #tpu.core_type<tc>, window_params = [{transform_indices = @transform_0, window_bounds = array<i64: 8, 256>}, {transform_indices = @transform_1, window_bounds = array<i64: 8, 1>}, {transform_indices = @transform_2, window_bounds = array<i64: 8, 1>}, {transform_indices = @transform_3, window_bounds = array<i64: 8, 256>}]} {
    %c0 = arith.constant 0 : index
    %c0_0 = arith.constant 0 : index
    %0 = vector.load %arg1[%c0, %c0_0] : memref<8x256xf32, #tpu.memory_space<vmem>>, vector<8x256xf32>
    %cst = arith.constant dense<0.000000e+00> : vector<8xf32>
    %1 = vector.multi_reduction <add>, %0, %cst [1] : vector<8x256xf32> to vector<8xf32>
    %2 = vector.shape_cast %1 : vector<8xf32> to vector<8x1xf32>
    %3 = arith.mulf %0, %0 : vector<8x256xf32>
    %cst_1 = arith.constant dense<0.000000e+00> : vector<8xf32>
    %4 = vector.multi_reduction <add>, %3, %cst_1 [1] : vector<8x256xf32> to vector<8xf32>
    %5 = vector.shape_cast %4 : vector<8xf32> to vector<8x1xf32>
    %cst_2 = arith.constant 3.906250e-03 : f32
    %6 = vector.broadcast %cst_2 : f32 to vector<8x1xf32>
    %7 = arith.mulf %2, %6 : vector<8x1xf32>
    %cst_3 = arith.constant 3.906250e-03 : f32
    %8 = vector.broadcast %cst_3 : f32 to vector<8x1xf32>
    %9 = arith.mulf %5, %8 : vector<8x1xf32>
    %10 = arith.mulf %7, %7 : vector<8x1xf32>
    %11 = arith.subf %9, %10 : vector<8x1xf32>
    %cst_4 = arith.constant 0.000000e+00 : f32
    %12 = vector.broadcast %cst_4 : f32 to vector<8x1xf32>
    %13 = arith.maximumf %11, %12 : vector<8x1xf32>
    %cst_5 = arith.constant 9.99999974E-6 : f32
    %14 = vector.broadcast %cst_5 : f32 to vector<8x1xf32>
    %15 = arith.addf %13, %14 : vector<8x1xf32>
    %16 = math.rsqrt %15 : vector<8x1xf32>
    %c0_6 = arith.constant 0 : index
    %c0_7 = arith.constant 0 : index
    %17 = vector.load %arg2[%c0_6, %c0_7] : memref<8x1xf32, #tpu.memory_space<vmem>>, vector<8x1xf32>
    %18 = arith.mulf %17, %16 : vector<8x1xf32>
    %c0_8 = arith.constant 0 : index
    %c0_9 = arith.constant 0 : index
    %19 = vector.load %arg3[%c0_8, %c0_9] : memref<8x1xf32, #tpu.memory_space<vmem>>, vector<8x1xf32>
    %20 = arith.mulf %7, %18 : vector<8x1xf32>
    %21 = arith.subf %19, %20 : vector<8x1xf32>
    %22 = vector.broadcast %18 : vector<8x1xf32> to vector<8x256xf32>
    %23 = arith.mulf %0, %22 : vector<8x256xf32>
    %24 = vector.broadcast %21 : vector<8x1xf32> to vector<8x256xf32>
    %25 = arith.addf %23, %24 : vector<8x256xf32>
    %c0_10 = arith.constant 0 : index
    %c0_11 = arith.constant 0 : index
    %26 = vector.load %arg4[%c0_10, %c0_11] : memref<8x256xf32, #tpu.memory_space<vmem>>, vector<8x256xf32>
    tpu.vector_store %arg4[%c0_10, %c0_11], %25 {strides = array<i32>} : memref<8x256xf32, #tpu.memory_space<vmem>>, vector<8x256xf32>,
    return
  }
  func.func @transform_0(%arg0: i32) -> (i32, i32) {
    %c0_i32 = arith.constant 0 : i32
    %c0_i32_0 = arith.constant 0 : i32
    return %arg0, %c0_i32 : i32, i32
  }
  func.func @transform_1(%arg0: i32) -> (i32, i32) {
    %c0_i32 = arith.constant 0 : i32
    %c0_i32_0 = arith.constant 0 : i32
    return %arg0, %c0_i32 : i32, i32
  }
  func.func @transform_2(%arg0: i32) -> (i32, i32) {
    %c0_i32 = arith.constant 0 : i32
    %c0_i32_0 = arith.constant 0 : i32
    return %arg0, %c0_i32 : i32, i32
  }
  func.func @transform_3(%arg0: i32) -> (i32, i32) {
    %c0_i32 = arith.constant 0 : i32
    %c0_i32_0 = arith.constant 0 : i32
    return %arg0, %c0_i32 : i32, i32
  }
}

</mosaic_0001>

<bundles_post_ra>
// kernel: tpu_custom_call.1
= control target key start
LH: loop header
LB: loop body
LE: loop exit
PB: predicated region body
PF: predicated region fallthrough
CT: control target
= control target key end

     0   :  { %s147_s0 = inlined_call_operand.vmem [shape: f32[8,256], index: 0, kind: input, shape index: {}]   ;;  %s148_s1 = inlined_call_operand.vmem [shape: f32[8,1], index: 1, kind: input, shape index: {}]   ;;  %s149_s2 = inlined_call_operand.vmem [shape: f32[8,1], index: 2, kind: input, shape index: {}]   ;;  %s150_s3 = inlined_call_operand.hbm [shape: f32[8,256], index: 3, kind: output, shape index: {}]  }
   0x1   :  { %v15_v0 = vld [vmem:[%s147_s0] sm:$0xff]  ;;  %v16_v1 = vld [vmem:[%s147_s0 + $0x8] sm:$0xff] }
   0x2   :  { %8 = vsyncpa [#allocation3], 0  ;;  %v17_v2 = vadd.f32 %v16_v1, %v15_v0  ;;  %v20_v3 = vmul.f32 %v15_v0, %v15_v0  ;;  %v21_v4 = vmul.f32 %v16_v1, %v16_v1  ;;  %v110_v6 = vmov 0   ;;  %v41_v21 = vld [vmem:[%s148_s1] sm:$0xff]  ;;  %s111_s19 = smov [#allocation2]   ;;  %s69_s1 = sshll.u32 %s150_s3, 4  ;;  %s70_s1 = int_to_ptr.hbm [resolvable:$true] %s69_s1 }
   0x3   :  { %80 = vset.pattern.permute.xlu1 %v110_v6  ;;  %81 = vset.pattern.permute.xlu0 %v110_v6  ;;  %v43_v25 = vld [vmem:[%s149_s2] sm:$0xff]  ;;  %s67_s20 = sshll.u32 %s111_s19, 4  ;;  %s68_s20 = int_to_ptr.vmem [resolvable:$true] %s67_s20 }
   0x4   :  { %18 = vadd.xlane.f32.xlu0 %v17_v2  ;;  %v22_v5 = vadd.f32 %v21_v4, %v20_v3 }
   0xc   :  { %23 = vadd.xlane.f32.xlu0 %v22_v5 }
  0x77   :  { %v19_v7 = vpop.xlane.xlu0 %18 }
  0x78   :  { %v25_v8 = vmul.f32 0.00390625, %v19_v7 }
  0x7a   :  { %v27_v10 = vmul.f32 %v25_v8, %v25_v8 }
  0x7f   :  { %v24_v9 = vpop.xlane.xlu0 %23 }
  0x80   :  { %v26_v11 = vmul.f32 0.00390625, %v24_v9 }
  0x82   :  { %v28_v12 = vsub.f32 %v26_v11, %v27_v10 }
  0x84   :  { %v29_v13 = vmax.f32 %v28_v12, 0.0 }
  0x86   :  { %v30_v14 = vadd.f32 1e-05, %v29_v13 }
  0x88   :  { %82 = vrsqrt.f32 %v30_v14  ;;  %vm37_vm1 = vweird.f32 %v30_v14 }
  0x8e   :  { %v83_v15 = vpop.eup %82 }
  0x8f   :  { %v32_v16 = vmul.f32 %v83_v15, %v30_v14  ;;  %vm38_vm0 = vweird.f32 %v83_v15 }
  0x90   :  { %vm39_vm2 = vmor %vm37_vm1, %vm38_vm0 }
  0x91   :  { %v33_v17 = vmul.f32 %v83_v15, %v32_v16 }
  0x93   :  { %v34_v18 = vmul.f32 0.5, %v33_v17 }
  0x95   :  { %v35_v19 = vsub.f32 1.5, %v34_v18 }
  0x97   :  { %v36_v20 = vmul.f32 %v83_v15, %v35_v19 }
  0x99   :  { %v40_v22 = vsel %vm39_vm2, %v83_v15, %v36_v20 }
  0x9a   :  { %v42_v23 = vmul.f32 %v41_v21, %v40_v22 }
  0x9c   :  { %48 = vperm.xlu1 %80, %v42_v23   ;;  %v44_v24 = vmul.f32 %v42_v23, %v25_v8 }
  0x9e   :  { %v45_v26 = vsub.f32 %v43_v25, %v44_v24 }
  0xa4   :  { %55 = vperm.xlu1 %80, %v45_v26  }
 0x10e   :  { %v49_v27 = vpop.permute.xlu1 %48 }
 0x10f   :  { %v51_v28 = vmul.f32 %v49_v27, %v15_v0  ;;  %v52_v29 = vmul.f32 %v49_v27, %v16_v1 }
 0x116   :  { %v56_v30 = vpop.permute.xlu1 %55 }
 0x117   :  { %v58_v31 = vadd.f32 %v56_v30, %v51_v28  ;;  %v59_v32 = vadd.f32 %v56_v30, %v52_v29 }
 0x119   :  { %60 = vst [vmem:[#allocation2] sm:$0xff] %v58_v31 }
 0x11a   :  { %61 = vst [vmem:[#allocation2 + $0x8] sm:$0xff] %v59_v32 }
 0x11b   :  { %72 = dma.vmem_to_hbm [thread:$0]  %s68_s20, 256, %s70_s1, [#allocation3]  }
 0x11c   :  { %108 = dma.done.wait [#allocation3], 256  }
 0x11d   :  { %109 = vsyncadd [#allocation3], 4294967040 }
 0x11e   :  { %77 = vsyncpa [#allocation3], 1 }

</bundles_post_ra>
